<compile_context>
chip_gen: v7x
topology: tpu7x:2x2x1
jax: 0.10.0
libtpu: 0.0.40
codegen_flags: <defaults>
</compile_context>

<pallas_src>
import functools

import jax
import jax.numpy as jnp
from jax import lax
from jax.experimental import pallas as pl
from jax.experimental.pallas import tpu as pltpu


def _round_up(x: int, m: int) -> int:
    return (x + m - 1) // m * m


def dan_kernel(ids_ref,      # SMEM (B_pad * S,) int32   -- scalar prefetch (flattened)
               table_ref,    # VMEM (V_pad, E_pad) f32   -- zero-padded embedding table
               w1_ref,       # VMEM (E_pad, H_pad) f32
               b1_ref,       # VMEM (1, H_pad) f32
               w2_ref,       # VMEM (H_pad, C_pad) f32   -- zero-padded columns
               b2_ref,       # VMEM (1, C_pad) f32       -- padded columns = -1e30
               out_ref,      # VMEM (TB, C_pad) f32
               pooled_ref,   # VMEM scratch (TB, E_pad) f32
               *, tile_b: int, seq_len: int, vocab: int):
    e_pad = pooled_ref.shape[1]
    base = pl.program_id(0) * (tile_b * seq_len)
    inv_s = 1.0 / seq_len

    # ---- fused embedding gather + mean-pool (O(B*S*E) VPU adds) ------------
    @pl.loop(0, tile_b)
    def _(b):
        def tok_body(s, acc):
            tok = ids_ref[base + b * seq_len + s]        # SMEM scalar read
            tok = jnp.clip(tok, 0, vocab - 1)            # guard OOB ids (no HW check)
            return acc + table_ref[pl.ds(tok, 1), :]     # dynamic VMEM row gather
        row = lax.fori_loop(0, seq_len, tok_body,
                            jnp.zeros((1, e_pad), jnp.float32))
        pooled_ref[pl.ds(b, 1), :] = row * inv_s

    # TODO(synk): dropout(p=0.3) is treated as eval-mode identity (deterministic forward).

    # fc1 + ReLU -> (TB, H_pad)
    h = jnp.dot(pooled_ref[...], w1_ref[...],
                preferred_element_type=jnp.float32) + b1_ref[...]
    h = jnp.maximum(h, 0.0)

    # fc3 -> (TB, C_pad); padded class columns carry bias -1e30.
    logits = jnp.dot(h, w2_ref[...],
                     preferred_element_type=jnp.float32) + b2_ref[...]

    # log_softmax over classes in f32 (padded columns contribute exp(-huge) == 0).
    m = jnp.max(logits, axis=1, keepdims=True)
    lse = m + jnp.log(jnp.sum(jnp.exp(logits - m), axis=1, keepdims=True))
    out_ref[...] = logits - lse


def dan_forward(token_ids, emb_table, w1, b1, w2, b2):
    """token_ids: (B, S) int32; returns (B, C) log-probs."""
    B, S = token_ids.shape
    V, E = emb_table.shape
    H = w1.shape[1]
    C = w2.shape[1]

    # Batch tile: 128-row blocks for large batches, 8-sublane granule otherwise.
    TB = 128 if B >= 128 else _round_up(max(B, 8), 8)
    B_pad = _round_up(B, TB)
    V_pad = _round_up(max(V, 8), 8)          # sublane granule for table rows
    E_pad = _round_up(max(E, 128), 128)      # lane-dense matmul operands
    H_pad = _round_up(max(H, 128), 128)
    C_pad = _round_up(max(C, 128), 128)      # lane-dense output

    # Flattened 1-D ids for compact SMEM scalar prefetch; padded rows use token 0
    # (valid row -> safe gather; those output rows are sliced off below).
    ids_p = jnp.zeros((B_pad, S), jnp.int32).at[:B, :].set(token_ids.astype(jnp.int32))
    ids_flat = ids_p.reshape(B_pad * S)

    # Pad parameters (cheap, weight-sized, done once in the wrapper).
    table_p = jnp.zeros((V_pad, E_pad), jnp.float32).at[:V, :E].set(emb_table.astype(jnp.float32))
    w1_p = jnp.zeros((E_pad, H_pad), jnp.float32).at[:E, :H].set(w1.astype(jnp.float32))
    b1_p = jnp.zeros((1, H_pad), jnp.float32).at[0, :H].set(b1.astype(jnp.float32))
    w2_p = jnp.zeros((H_pad, C_pad), jnp.float32).at[:H, :C].set(w2.astype(jnp.float32))
    b2_p = jnp.full((1, C_pad), -1e30, jnp.float32).at[0, :C].set(b2.astype(jnp.float32))

    kernel = functools.partial(dan_kernel, tile_b=TB, seq_len=S, vocab=V)

    out = pl.pallas_call(
        kernel,
        out_shape=jax.ShapeDtypeStruct((B_pad, C_pad), jnp.float32),
        grid_spec=pltpu.PrefetchScalarGridSpec(
            num_scalar_prefetch=1,            # flattened token_ids -> SMEM
            grid=(B_pad // TB,),              # batch tiles (pipelined / megacore)
            in_specs=[
                pl.BlockSpec((V_pad, E_pad), lambda i, ids: (0, 0)),   # table resident
                pl.BlockSpec((E_pad, H_pad), lambda i, ids: (0, 0)),
                pl.BlockSpec((1, H_pad), lambda i, ids: (0, 0)),
                pl.BlockSpec((H_pad, C_pad), lambda i, ids: (0, 0)),
                pl.BlockSpec((1, C_pad), lambda i, ids: (0, 0)),
            ],
            out_specs=pl.BlockSpec((TB, C_pad), lambda i, ids: (i, 0)),
            scratch_shapes=[pltpu.VMEM((TB, E_pad), jnp.float32)],
        ),
        compiler_params=pltpu.CompilerParams(
            dimension_semantics=("parallel",),
            vmem_limit_bytes=32 * 1024 * 1024,
        ),
    )(ids_flat, table_p, w1_p, b1_p, w2_p, b2_p)

    # Slice padded batch rows / class lanes back to the logical shape.
    return out[:B, :C]


if __name__ == "__main__":
    # Small, deterministic config.
    B, S = 2, 8          # batch, sequence length
    VOCAB = 50           # vocabulary size
    E = 32               # embedding dim
    H = 32               # hidden size
    C = 2                # num classes

    key = jax.random.PRNGKey(0)
    k_emb, k_ids, k_w1, k_b1, k_w2, k_b2 = jax.random.split(key, 6)

    emb_table = jax.random.normal(k_emb, (VOCAB, E), dtype=jnp.float32) * 0.1
    token_ids = jax.random.randint(k_ids, (B, S), 0, VOCAB, dtype=jnp.int32)

    # Deterministic "Linear" params (Kaiming-ish scale).
    w1 = jax.random.normal(k_w1, (E, H), dtype=jnp.float32) * (1.0 / (E ** 0.5))
    b1 = jax.random.normal(k_b1, (H,), dtype=jnp.float32) * 0.01
    w2 = jax.random.normal(k_w2, (H, C), dtype=jnp.float32) * (1.0 / (H ** 0.5))
    b2 = jax.random.normal(k_b2, (C,), dtype=jnp.float32) * 0.01

    out = dan_forward(token_ids, emb_table, w1, b1, w2, b2)
    out = jax.block_until_ready(out)

    # Pure-JAX reference check (gather + mean path, as in the PyTorch module).
    emb = emb_table[token_ids]
    pooled = jnp.mean(emb, axis=1)
    h = jnp.maximum(pooled @ w1 + b1, 0.0)
    logits = h @ w2 + b2
    ref = jax.nn.log_softmax(logits, axis=1)

    assert out.shape == (B, C)
    assert jnp.allclose(out, ref, atol=1e-3, rtol=1e-3), (out, ref)

    print("KERNEL_OK")
</pallas_src>

<mosaic_0001>
module attributes {stable_mosaic.version = 11 : i64} {
  func.func @dan_kernel(%arg0: i32, %arg1: memref<64xi32, #tpu.memory_space<smem>>, %arg2: memref<56x128xf32, #tpu.memory_space<vmem>>, %arg3: memref<128x128xf32, #tpu.memory_space<vmem>>, %arg4: memref<1x128xf32, #tpu.memory_space<vmem>>, %arg5: memref<128x128xf32, #tpu.memory_space<vmem>>, %arg6: memref<1x128xf32, #tpu.memory_space<vmem>>, %arg7: memref<8x128xf32, #tpu.memory_space<vmem>>, %arg8: memref<8x128xf32, #tpu.memory_space<vmem>>) attributes {dimension_semantics = [#tpu.dimension_semantics<parallel>], iteration_bounds = array<i64: 1>, scalar_prefetch = 1 : i64, scratch_operands = 1 : i64, tpu.core_type = #tpu.core_type<tc>, window_params = [{pipeline_mode = #tpu.pipeline_mode<synchronous>, transform_indices = @transform_0, window_bounds = array<i64: 56, 128>}, {pipeline_mode = #tpu.pipeline_mode<synchronous>, transform_indices = @transform_1, window_bounds = array<i64: 128, 128>}, {pipeline_mode = #tpu.pipeline_mode<synchronous>, transform_indices = @transform_2, window_bounds = array<i64: 1, 128>}, {pipeline_mode = #tpu.pipeline_mode<synchronous>, transform_indices = @transform_3, window_bounds = array<i64: 128, 128>}, {pipeline_mode = #tpu.pipeline_mode<synchronous>, transform_indices = @transform_4, window_bounds = array<i64: 1, 128>}, {transform_indices = @transform_5, window_bounds = array<i64: 8, 128>}]} {
    %c64_i32 = arith.constant 64 : i32
    %0 = arith.muli %arg0, %c64_i32 : i32
    %c0_i32 = arith.constant 0 : i32
    %c8_i32 = arith.constant 8 : i32
    %1 = arith.addi %c0_i32, %c8_i32 : i32
    %c1_i32 = arith.constant 1 : i32
    scf.for %arg9 = %c0_i32 to %1 step %c1_i32  : i32 {
      %c1_i32_16 = arith.constant 1 : i32
      %27 = arith.muli %arg9, %c1_i32_16 : i32
      %c0_i32_17 = arith.constant 0 : i32
      %28 = arith.addi %c0_i32_17, %27 : i32
      %cst_18 = arith.constant 0.000000e+00 : f32
      %29 = vector.broadcast %cst_18 : f32 to vector<1x128xf32>
      %c0_i32_19 = arith.constant 0 : i32
      %c8_i32_20 = arith.constant 8 : i32
      %30 = arith.addi %c0_i32_19, %c8_i32_20 : i32
      %c1_i32_21 = arith.constant 1 : i32
      %31 = scf.for %arg10 = %c0_i32_19 to %30 step %c1_i32_21 iter_args(%arg11 = %29) -> (vector<1x128xf32>)  : i32 {
        %c8_i32_25 = arith.constant 8 : i32
        %36 = arith.muli %28, %c8_i32_25 : i32
        %37 = arith.addi %0, %36 : i32
        %38 = arith.addi %37, %arg10 : i32
        %39 = arith.index_cast %38 : i32 to index
        %40 = memref.load %arg1[%39] : memref<64xi32, #tpu.memory_space<smem>>
        %c0_i32_26 = arith.constant 0 : i32
        %c49_i32 = arith.constant 49 : i32
        %41 = arith.maxsi %c0_i32_26, %40 : i32
        %42 = arith.minsi %c49_i32, %41 : i32
        %43 = arith.index_cast %42 : i32 to index
        %c0_27 = arith.constant 0 : index
        %44 = vector.load %arg2[%43, %c0_27] : memref<56x128xf32, #tpu.memory_space<vmem>>, vector<1x128xf32>
        %45 = arith.addf %arg11, %44 : vector<1x128xf32>
        scf.yield %45 : vector<1x128xf32>
      }
      %c8_i32_22 = arith.constant 8 : i32
      %cst_23 = arith.constant 1.250000e-01 : f32
      %32 = vector.broadcast %cst_23 : f32 to vector<1x128xf32>
      %33 = arith.mulf %31, %32 : vector<1x128xf32>
      %34 = arith.index_cast %28 : i32 to index
      %c0_24 = arith.constant 0 : index
      %35 = vector.load %arg8[%34, %c0_24] : memref<8x128xf32, #tpu.memory_space<vmem>>, vector<1x128xf32>
      tpu.vector_store %arg8[%34, %c0_24], %33 {strides = array<i32>} : memref<8x128xf32, #tpu.memory_space<vmem>>, vector<1x128xf32>,
    }
    %c8_i32_0 = arith.constant 8 : i32
    %c0 = arith.constant 0 : index
    %c0_1 = arith.constant 0 : index
    %2 = vector.load %arg8[%c0, %c0_1] : memref<8x128xf32, #tpu.memory_space<vmem>>, vector<8x128xf32>
    %c0_2 = arith.constant 0 : index
    %c0_3 = arith.constant 0 : index
    %3 = vector.load %arg3[%c0_2, %c0_3] : memref<128x128xf32, #tpu.memory_space<vmem>>, vector<128x128xf32>
    %cst = arith.constant dense<0.000000e+00> : vector<8x128xf32>
    %4 = tpu.matmul %2, %3, %cst {dimension_numbers = #tpu.dot_dimension_numbers<[1], [0], [0], [1], [0, 0, 1, 1], [], []>} : vector<8x128xf32>, vector<128x128xf32>, vector<8x128xf32> -> vector<8x128xf32>
    %c0_4 = arith.constant 0 : index
    %c0_5 = arith.constant 0 : index
    %5 = vector.load %arg4[%c0_4, %c0_5] : memref<1x128xf32, #tpu.memory_space<vmem>>, vector<1x128xf32>
    %6 = vector.broadcast %5 : vector<1x128xf32> to vector<8x128xf32>
    %7 = arith.addf %4, %6 : vector<8x128xf32>
    %cst_6 = arith.constant 0.000000e+00 : f32
    %8 = vector.broadcast %cst_6 : f32 to vector<8x128xf32>
    %9 = arith.maximumf %7, %8 : vector<8x128xf32>
    %c0_7 = arith.constant 0 : index
    %c0_8 = arith.constant 0 : index
    %10 = vector.load %arg5[%c0_7, %c0_8] : memref<128x128xf32, #tpu.memory_space<vmem>>, vector<128x128xf32>
    %cst_9 = arith.constant dense<0.000000e+00> : vector<8x128xf32>
    %11 = tpu.matmul %9, %10, %cst_9 {dimension_numbers = #tpu.dot_dimension_numbers<[1], [0], [0], [1], [0, 0, 1, 1], [], []>} : vector<8x128xf32>, vector<128x128xf32>, vector<8x128xf32> -> vector<8x128xf32>
    %c0_10 = arith.constant 0 : index
    %c0_11 = arith.constant 0 : index
    %12 = vector.load %arg6[%c0_10, %c0_11] : memref<1x128xf32, #tpu.memory_space<vmem>>, vector<1x128xf32>
    %13 = vector.broadcast %12 : vector<1x128xf32> to vector<8x128xf32>
    %14 = arith.addf %11, %13 : vector<8x128xf32>
    %cst_12 = arith.constant dense<0xFF800000> : vector<8xf32>
    %15 = vector.multi_reduction <maximumf>, %14, %cst_12 [1] : vector<8x128xf32> to vector<8xf32>
    %16 = vector.shape_cast %15 : vector<8xf32> to vector<8x1xf32>
    %17 = vector.broadcast %16 : vector<8x1xf32> to vector<8x128xf32>
    %18 = arith.subf %14, %17 : vector<8x128xf32>
    %19 = math.exp %18 : vector<8x128xf32>
    %cst_13 = arith.constant dense<0.000000e+00> : vector<8xf32>
    %20 = vector.multi_reduction <add>, %19, %cst_13 [1] : vector<8x128xf32> to vector<8xf32>
    %21 = vector.shape_cast %20 : vector<8xf32> to vector<8x1xf32>
    %22 = math.log %21 : vector<8x1xf32>
    %23 = arith.addf %16, %22 : vector<8x1xf32>
    %24 = vector.broadcast %23 : vector<8x1xf32> to vector<8x128xf32>
    %25 = arith.subf %14, %24 : vector<8x128xf32>
    %c0_14 = arith.constant 0 : index
    %c0_15 = arith.constant 0 : index
    %26 = vector.load %arg7[%c0_14, %c0_15] : memref<8x128xf32, #tpu.memory_space<vmem>>, vector<8x128xf32>
    tpu.vector_store %arg7[%c0_14, %c0_15], %25 {strides = array<i32>} : memref<8x128xf32, #tpu.memory_space<vmem>>, vector<8x128xf32>,
    return
  }
  func.func @transform_0(%arg0: i32, %arg1: memref<64xi32, #tpu.memory_space<smem>>) -> (i32, i32) {
    %c0_i32 = arith.constant 0 : i32
    %c0_i32_0 = arith.constant 0 : i32
    %c0_i32_1 = arith.constant 0 : i32
    return %c0_i32, %c0_i32_0 : i32, i32
  }
  func.func @transform_1(%arg0: i32, %arg1: memref<64xi32, #tpu.memory_space<smem>>) -> (i32, i32) {
    %c0_i32 = arith.constant 0 : i32
    %c0_i32_0 = arith.constant 0 : i32
    %c0_i32_1 = arith.constant 0 : i32
    return %c0_i32, %c0_i32_0 : i32, i32
  }
  func.func @transform_2(%arg0: i32, %arg1: memref<64xi32, #tpu.memory_space<smem>>) -> (i32, i32) {
    %c0_i32 = arith.constant 0 : i32
    %c0_i32_0 = arith.constant 0 : i32
    %c0_i32_1 = arith.constant 0 : i32
    return %c0_i32, %c0_i32_0 : i32, i32
  }
  func.func @transform_3(%arg0: i32, %arg1: memref<64xi32, #tpu.memory_space<smem>>) -> (i32, i32) {
    %c0_i32 = arith.constant 0 : i32
    %c0_i32_0 = arith.constant 0 : i32
    %c0_i32_1 = arith.constant 0 : i32
    return %c0_i32, %c0_i32_0 : i32, i32
  }
  func.func @transform_4(%arg0: i32, %arg1: memref<64xi32, #tpu.memory_space<smem>>) -> (i32, i32) {
    %c0_i32 = arith.constant 0 : i32
    %c0_i32_0 = arith.constant 0 : i32
    %c0_i32_1 = arith.constant 0 : i32
    return %c0_i32, %c0_i32_0 : i32, i32
  }
  func.func @transform_5(%arg0: i32, %arg1: memref<64xi32, #tpu.memory_space<smem>>) -> (i32, i32) {
    %c0_i32 = arith.constant 0 : i32
    %c0_i32_0 = arith.constant 0 : i32
    return %arg0, %c0_i32 : i32, i32
  }
}

</mosaic_0001>

<bundles_post_ra>
// kernel: tpu_custom_call.1
= control target key start
LH: loop header
LB: loop body
LE: loop exit
PB: predicated region body
PF: predicated region fallthrough
CT: control target
= control target key end

     0   :  { %s804_s0 = inlined_call_operand.hbm [shape: s32[64], index: 0, kind: input, shape index: {}]   ;;  %s805_s1 = inlined_call_operand.hbm [shape: f32[56,128], index: 1, kind: input, shape index: {}]   ;;  %s806_s2 = inlined_call_operand.hbm [shape: f32[128,128], index: 2, kind: input, shape index: {}]   ;;  %s807_s3 = inlined_call_operand.vmem [shape: f32[1,128], index: 3, kind: input, shape index: {}]   ;;  %s808_s4 = inlined_call_operand.hbm [shape: f32[128,128], index: 4, kind: input, shape index: {}]   ;;  %s809_s5 = inlined_call_operand.vmem [shape: f32[1,128], index: 5, kind: input, shape index: {}]   ;;  %s810_s6 = inlined_call_operand.hbm [shape: f32[8,128], index: 6, kind: output, shape index: {}]  }
   0x1   :  { %s526_s23 = scalar_lea.hbm %s804_s0, 16 }
   0x2   :  { %p527_p0 = scmp.ne.s32.totalorder %s804_s0, %s526_s23  ;;  %p530_p1 = scmp.lt.u32.totalorder %s526_s23, %s804_s0 }
   0x4   :  { %p532_p2 = pnand %p530_p1, %p527_p0 }
   0x6   :  { %535 = shalt.err (!%p532_p2)  }
   0x7   :  { %s656_s28 = smov [#allocation4]  }
   0x8   :  { %12 = dma.hbm_to_smem %s804_s0, 16, %s656_s28, [#allocation3] }
   0x9   :  { %636 = dma.done.wait [#allocation3], 16 }
   0xa   :  { %637 = vsyncadd [#allocation3], 4294967280 }
   0xb   :  { %14 = sfence }
   0xc   :  { %15 = vsyncpa [#allocation6], 0 }
   0xd   :  { %16 = vsyncpa [#allocation9], 0 }
   0xe   :  { %17 = vsyncpa [#allocation7], 0  ;;  %s657_s7 = smov [#allocation8]   ;;  %s658_s9 = smov [#allocation5]  }
   0xf   :  { %s35_s8 = sshll.u32 %s657_s7, 4  ;;  %s23_s10 = sshll.u32 %s658_s9, 4  ;;  %s36_s8 = int_to_ptr.vmem [resolvable:$true] %s35_s8  ;;  %s713_s10 = int_to_ptr.vmem [resolvable:$true] %s23_s10 }
  0x10   :  { %s536_s13 = scalar_lea.hbm %s806_s2, 2048 }
  0x11   :  { %p537_p3 = scmp.ne.s32.totalorder %s806_s2, %s536_s13  ;;  %p540_p4 = scmp.lt.u32.totalorder %s536_s13, %s806_s2 }
  0x13   :  { %p542_p5 = pnand %p540_p4, %p537_p3 }
  0x15   :  { %545 = shalt.err (!%p542_p5)
}
  0x16   :  { %s546_s17 = scalar_lea.vmem %s36_s8, 2048  ;;  %p551_p7 = scmp.lt.s32.totalorder %s36_s8, %s36_s8 }
  0x17   :  { %p547_p6 = scmp.ne.s32.totalorder %s36_s8, %s546_s17  ;;  %p552_p8 = scmp.lt.s32.totalorder %s546_s17, %s546_s17 }
  0x19   :  { %p553_p9 = por %p552_p8, %p551_p7 }
  0x1b   :  { %p554_p10 = pnand %p553_p9, %p547_p6 }
  0x1d   :  { %557 = shalt.err (!%p554_p10)
}
  0x1e   :  { %s659_s18 = smov 128   ;;  %s660_s19 = smov 8  }
  0x1f   :  { %41 = dma.hbm_to_vmem [thread:$0]  %s806_s2, 2048, %s36_s8, [#allocation9], %s659_s18, %s659_s18, %s660_s19  }
  0x20   :  { %s558_s24 = scalar_lea.hbm %s805_s1, 896 }
  0x21   :  { %p559_p11 = scmp.ne.s32.totalorder %s805_s1, %s558_s24  ;;  %p562_p12 = scmp.lt.u32.totalorder %s558_s24, %s805_s1 }
  0x23   :  { %p564_p13 = pnand %p562_p12, %p559_p11 }
  0x25   :  { %567 = shalt.err (!%p564_p13)
}
  0x26   :  { %s568_s29 = scalar_lea.vmem %s713_s10, 896  ;;  %p573_p1 = scmp.lt.s32.totalorder %s713_s10, %s713_s10 }
  0x27   :  { %p569_p0 = scmp.ne.s32.totalorder %s713_s10, %s568_s29  ;;  %p574_p2 = scmp.lt.s32.totalorder %s568_s29, %s568_s29 }
  0x29   :  { %p575_p3 = por %p574_p2, %p573_p1 }
  0x2b   :  { %p576_p4 = pnand %p575_p3, %p569_p0 }
  0x2d   :  { %579 = shalt.err (!%p576_p4)
}
  0x2e   :  { %29 = dma.hbm_to_vmem [thread:$0]  %s805_s1, 896, %s713_s10, [#allocation6], %s659_s18, %s659_s18, %s660_s19  }
  0x2f   :  { %s661_s7 = smov [#allocation10]   ;;  %s580_s12 = scalar_lea.hbm %s808_s4, 2048 }
  0x30   :  { %s49_s8 = sshll.u32 %s661_s7, 4  ;;  %p581_p5 = scmp.ne.s32.totalorder %s808_s4, %s580_s12  ;;  %s50_s8 = int_to_ptr.vmem [resolvable:$true] %s49_s8 }
  0x31   :  { %p584_p6 = scmp.lt.u32.totalorder %s580_s12, %s808_s4 }
  0x33   :  { %p586_p7 = pnand %p584_p6, %p581_p5 }
  0x35   :  { %589 = shalt.err (!%p586_p7)
}
  0x36   :  { %s590_s16 = scalar_lea.vmem %s50_s8, 2048  ;;  %p595_p9 = scmp.lt.s32.totalorder %s50_s8, %s50_s8 }
  0x37   :  { %p591_p8 = scmp.ne.s32.totalorder %s50_s8, %s590_s16  ;;  %p596_p10 = scmp.lt.s32.totalorder %s590_s16, %s590_s16 }
  0x39   :  { %p597_p11 = por %p596_p10, %p595_p9 }
  0x3b   :  { %p598_p12 = pnand %p597_p11, %p591_p8 }
  0x3d   :  { %601 = shalt.err (!%p598_p12)
}
  0x3e   :  { %55 = dma.hbm_to_vmem [thread:$0]  %s808_s4, 2048, %s50_s8, [#allocation9], %s659_s18, %s659_s18, %s660_s19  }
  0x3f   :  { %638 = dma.done.wait [#allocation6], 896  }
  0x40   :  { %639 = vsyncadd [#allocation6], 4294966400 }
  0x41   :  { %640 = dma.done.wait [#allocation9], 4096  }
  0x42   :  { %641 = vsyncadd [#allocation9], 4294963200  ;;  %s765_s17 = smov 0  }
  0x43 LB: > { %v648_v0 = vmov 0.0   ;;  %s652_s20 = smov 0   ;;  %s646_s17 = sphi %s765_s17, %s73_s17  }
  0x44 LB: >> { %s326_s21 = sshll.u32 %s646_s17, 3  ;;  %s654_s20 = sphi %s652_s20, %s79_s20   ;;  %v650_v0 = vphi %v648_v0, %v649_v0  }
  0x45   : >> { %s83_s22 = sadd.s32 %s654_s20, %s326_s21  ;;  %s79_s20 = sadd.s32 1, %s654_s20  }
  0x46   : >> { %s84_s23 = sld [smem:[#allocation4 + %s83_s22]]  ;;  %p76_p1 = scmp.ge.s32.totalorder %s79_s20, 8  }
  0x47   : > { %s93_s18 = scalar_lea.vmem (%p76_p1), [#allocation2], %s646_s17  ;;  %s73_s17 = sadd.s32 (%p76_p1), 1, %s646_s17  }
  0x48   : > { %p70_p2 = scmp.ge.s32.totalorder (%p76_p1), %s73_s17, 8  }
  0x4c   : >> { %p85_p13 = scmp.gt.s32.totalorder %s84_s23, 0  ;;  %p327_p0 = scmp.lt.s32.totalorder %s84_s23, 49 }
  0x4e   : >> { %s812_s23 = smov (!%p85_p13, %s84_s23), 0  ;;  %78 = sbr.rel (!%p76_p1) target bundleno = 68 (0x44), region = 68 }
  0x4f   : >> { %s814_s23 = smov (!%p327_p0, %s812_s23), 49 }
  0x50   : >> { %s89_s4 = scalar_lea.vmem [#allocation5], %s814_s23 }
  0x51   : >> { %v90_v1 = vld [vmem:[%s89_s4] sm:$0x1] }
  0x52   : >> { %v91_v2 = vadd.f32 %v650_v0, %v90_v1  }
  0x54   : >> { %v649_v0 = vmov %v91_v2   ;;  %v92_v3 = vmul.f32 (%p76_p1), 0.125, %v91_v2 }
  0x55   :  { %72 = sbr.rel (!%p70_p2) target bundleno = 67 (0x43), region = 79  ;;  %v96_v4 = vld [vmem:[#allocation8] sm:$0xff] (%p70_p2)  ;;  %v97_v5 = vld [vmem:[#allocation8 + $0x8] sm:$0xff] (%p70_p2)  ;;  %v98_v6 = vld [vmem:[#allocation8 + $0x10] sm:$0xff] (%p70_p2)  ;;  %v662_v7 = vmov (%p70_p2), 0.0|0.0   ;;  %vm663_vm0 = vmmov (%p70_p2), 0  }
  0x56   : > { %94 = vst [vmem:[%s93_s18] sm:$0x1] %v92_v3  ;;  %440 = vmatprep.subr.bf16.mxu0 (%p70_p2), %v662_v7  ;;  %v441_v8 = vpack.c.bf16 (%p70_p2), %v97_v5, %v96_v4  ;;  %v99_v9 = vld [vmem:[#allocation8 + $0x18] sm:$0xff] (%p70_p2)  ;;  %v664_v10 = vmov (%p70_p2), 0.0   ;;  %464 = vmatprep.subr.bf16.mxu1 (%p70_p2), %v662_v7  ;;  %v100_v12 = vld [vmem:[#allocation8 + $0x20] sm:$0xff] (%p70_p2)  ;;  %v101_v13 = vld [vmem:[#allocation8 + $0x28] sm:$0xff] (%p70_p2) }
  0x57   :  { %402 = vmatprep.mubr.msk.f32.mxu0 (%p70_p2), %vm663_vm0, %v664_v10  ;;  %437 = vmatprep.mubr.msk.f32.mxu1 (%p70_p2), %vm663_vm0, %v664_v10  ;;  %v444_v11 = vpack.c.bf16 (%p70_p2), %v99_v9, %v98_v6  ;;  %v190_v14 = vld [vmem:[#allocation10] sm:$0xff] (%p70_p2)  ;;  %v191_v15 = vld [vmem:[#allocation10 + $0x8] sm:$0xff] (%p70_p2)  ;;  %v192_v16 = vld [vmem:[#allocation10 + $0x10] sm:$0xff] (%p70_p2)  ;;  %v447_v18 = vpack.c.bf16 (%p70_p2), %v101_v13, %v100_v12 }
  0x58   :  { %442 = vmatpush3.bf16.msra.mxu0 (%p70_p2), %v441_v8  ;;  %v193_v17 = vld [vmem:[#allocation10 + $0x18] sm:$0xff] (%p70_p2)  ;;  %v465_v19 = vpack.c.bf16 (%p70_p2), %v191_v15, %v190_v14  ;;  %v102_v20 = vld [vmem:[#allocation8 + $0x30] sm:$0xff] (%p70_p2)  ;;  %v194_v23 = vld [vmem:[#allocation10 + $0x20] sm:$0xff] (%p70_p2) }
  0x59   :  { %443 = vmatprep.subr.bf16.mxu0 (%p70_p2), %v662_v7  ;;  %v103_v21 = vld [vmem:[#allocation8 + $0x38] sm:$0xff] (%p70_p2)  ;;  %v468_v22 = vpack.c.bf16 (%p70_p2), %v193_v17, %v192_v16  ;;  %v195_v24 = vld [vmem:[#allocation10 + $0x28] sm:$0xff] (%p70_p2)  ;;  %v104_v26 = vld [vmem:[#allocation8 + $0x40] sm:$0xff] (%p70_p2) }
  0x5a   :  { %466 = vmatpush3.bf16.msra.mxu1 (%p70_p2), %v465_v19  ;;  %v450_v25 = vpack.c.bf16 (%p70_p2), %v103_v21, %v102_v20  ;;  %v105_v27 = vld [vmem:[#allocation8 + $0x48] sm:$0xff] (%p70_p2)  ;;  %v471_v28 = vpack.c.bf16 (%p70_p2), %v195_v24, %v194_v23  ;;  %v196_v29 = vld [vmem:[#allocation10 + $0x30] sm:$0xff] (%p70_p2)  ;;  %v197_v30 = vld [vmem:[#allocation10 + $0x38] sm:$0xff] (%p70_p2) }
  0x5b   :  { %467 = vmatprep.subr.bf16.mxu1 (%p70_p2), %v662_v7  ;;  %v453_v31 = vpack.c.bf16 (%p70_p2), %v105_v27, %v104_v26  ;;  %v106_v32 = vld [vmem:[#allocation8 + $0x50] sm:$0xff] (%p70_p2)  ;;  %v107_v33 = vld [vmem:[#allocation8 + $0x58] sm:$0xff] (%p70_p2)  ;;  %v474_v34 = vpack.c.bf16 (%p70_p2), %v197_v30, %v196_v29  ;;  %v198_v35 = vld [vmem:[#allocation10 + $0x40] sm:$0xff] (%p70_p2) }
  0x5c   :  { %445 = vmatpush3.bf16.msra.mxu0 %v444_v11  ;;  %v199_v36 = vld [vmem:[#allocation10 + $0x48] sm:$0xff]  ;;  %v456_v37 = vpack.c.bf16 %v107_v33, %v106_v32  ;;  %v108_v38 = vld [vmem:[#allocation8 + $0x60] sm:$0xff]  ;;  %v200_v41 = vld [vmem:[#allocation10 + $0x50] sm:$0xff] }
  0x5d   :  { %446 = vmatprep.subr.bf16.mxu0 %v662_v7  ;;  %v109_v39 = vld [vmem:[#allocation8 + $0x68] sm:$0xff]  ;;  %v477_v40 = vpack.c.bf16 %v199_v36, %v198_v35  ;;  %v201_v42 = vld [vmem:[#allocation10 + $0x58] sm:$0xff]  ;;  %v110_v44 = vld [vmem:[#allocation8 + $0x70] sm:$0xff] }
  0x5e   :  { %469 = vmatpush3.bf16.msra.mxu1 %v468_v22  ;;  %v459_v43 = vpack.c.bf16 %v109_v39, %v108_v38  ;;  %v111_v45 = vld [vmem:[#allocation8 + $0x78] sm:$0xff]  ;;  %v480_v46 = vpack.c.bf16 %v201_v42, %v200_v41  ;;  %v202_v47 = vld [vmem:[#allocation10 + $0x60] sm:$0xff]  ;;  %v203_v48 = vld [vmem:[#allocation10 + $0x68] sm:$0xff] }
  0x5f   :  { %470 = vmatprep.subr.bf16.mxu1 %v662_v7  ;;  %v462_v49 = vpack.c.bf16 %v111_v45, %v110_v44  ;;  %v483_v50 = vpack.c.bf16 %v203_v48, %v202_v47  ;;  %v95_v51 = vld [vmem:[#allocation2] sm:$0xff]  ;;  %v204_v52 = vld [vmem:[#allocation10 + $0x70] sm:$0xff]  ;;  %v205_v53 = vld [vmem:[#allocation10 + $0x78] sm:$0xff] }
  0x60   :  { %448 = vmatpush3.bf16.msra.mxu0 %v447_v18  ;;  %v486_v54 = vpack.c.bf16 %v205_v53, %v204_v52  ;;  %v332_v55 = vld [vmem:[%s807_s3] ss:$0 sm:$0xff]  ;;  %s665_s3 = smov [#allocation11]  }
  0x61   :  { %449 = vmatprep.subr.bf16.mxu0 %v662_v7  ;;  %v333_v60 = vld [vmem:[%s809_s5] ss:$0 sm:$0xff]  ;;  %s301_s27 = sshll.u32 %s665_s3, 4  ;;  %s302_s27 = int_to_ptr.vmem [resolvable:$true] %s301_s27 }
  0x62   :  { %472 = vmatpush3.bf16.msra.mxu1 %v471_v28  ;;  %s602_s5 = scalar_lea.vmem %s302_s27, 128  ;;  %p607_p4 = scmp.lt.s32.totalorder %s302_s27, %s302_s27 }
  0x63   :  { %473 = vmatprep.subr.bf16.mxu1 %v662_v7  ;;  %p603_p3 = scmp.ne.s32.totalorder %s302_s27, %s602_s5  ;;  %p608_p5 = scmp.lt.s32.totalorder %s602_s5, %s602_s5 }
  0x64   :  { %451 = vmatpush3.bf16.msra.mxu0 %v450_v25 }
  0x65   :  { %452 = vmatprep.subr.bf16.mxu0 %v662_v7  ;;  %p609_p6 = por %p608_p5, %p607_p4 }
  0x66   :  { %475 = vmatpush3.bf16.msra.mxu1 %v474_v34 }
  0x67   :  { %476 = vmatprep.subr.bf16.mxu1 %v662_v7  ;;  %p610_p7 = pnand %p609_p6, %p603_p3 }
  0x68   :  { %454 = vmatpush3.bf16.msra.mxu0 %v453_v31 }
  0x69   :  { %455 = vmatprep.subr.bf16.mxu0 %v662_v7 }
  0x6a   :  { %478 = vmatpush3.bf16.msra.mxu1 %v477_v40 }
  0x6b   :  { %479 = vmatprep.subr.bf16.mxu1 %v662_v7 }
  0x6c   :  { %457 = vmatpush3.bf16.msra.mxu0 %v456_v37 }
  0x6d   :  { %458 = vmatprep.subr.bf16.mxu0 %v662_v7 }
  0x6e   :  { %481 = vmatpush3.bf16.msra.mxu1 %v480_v46 }
  0x6f   :  { %482 = vmatprep.subr.bf16.mxu1 %v662_v7 }
  0x70   :  { %460 = vmatpush3.bf16.msra.mxu0 %v459_v43 }
  0x71   :  { %461 = vmatprep.subr.bf16.mxu0 %v662_v7 }
  0x72   :  { %484 = vmatpush3.bf16.msra.mxu1 %v483_v50 }
  0x73   :  { %485 = vmatprep.subr.bf16.mxu1 %v662_v7 }
  0x74   :  { %463 = vmatpush3.bf16.msra.mxu0 %v462_v49 }
  0x76   :  { %487 = vmatpush3.bf16.msra.mxu1 %v486_v54 }
  0x77   :  { %403 = vmatmul.mubr.f32.vlgmr.msra.gmra.mrb[0].mxu0 %v95_v51 }
 0x14a   :  { %v185_v56 = vpop.f32.mrb[0].mxu0 }
 0x14b   :  { %v186_v57 = vadd.f32 %v332_v55, %v185_v56  ;;  %v404_v58 = vpop.f32.mrb[1].mxu0 }
 0x14d   :  { %v189_v59 = vmax.f32 %v186_v57, 0.0 }
 0x14f   :  { %438 = vmatmul.mubr.f32.vlgmr.msra.gmra.mrb[0].mxu1 %v189_v59 }
 0x222   :  { %v279_v61 = vpop.f32.mrb[0].mxu1 }
 0x223   :  { %v280_v62 = vadd.f32 %v333_v60, %v279_v61  ;;  %v439_v63 = vpop.f32.mrb[1].mxu1 }
 0x225   :  { %283 = vmax.xlane.f32.xlu0 %v280_v62 }
 0x2b2   :  { %v284_v0 = vpop.xlane.xlu0 %283 }
 0x2b3   :  { %v285_v1 = vsub.f32 %v280_v62, %v284_v0 }
 0x2b5   :  { %v286_v2 = vmul.f32 1.442695, %v285_v1 }
 0x2b7   :  { %522 = vpow2.f32 %v286_v2 }
 0x2c1   :  { %v523_v3 = vpop.eup %522 }
 0x2c2   :  { %288 = vadd.xlane.f32.xlu0 %v523_v3 }
 0x34f   :  { %v289_v4 = vpop.xlane.xlu0 %288 }
 0x350   :  { %524 = vlog2.f32 %v289_v4 }
 0x35a   :  { %v525_v5 = vpop.eup %524 }
 0x35b   :  { %v291_v6 = vmul.f32 0.6931472, %v525_v5 }
 0x35d   :  { %v292_v7 = vadd.f32 %v291_v6, %v284_v0 }
 0x35f   :  { %v293_v8 = vsub.f32 %v280_v62, %v292_v7 }
 0x361   :  { %294 = vst [vmem:[#allocation11] sm:$0xff] %v293_v8 }
 0x362   :  { %613 = shalt.err (!%p610_p7)
}
 0x363   :  { %s614_s2 = scalar_lea.hbm %s810_s6, 128 }
 0x364   :  { %p615_p8 = scmp.ne.s32.totalorder %s810_s6, %s614_s2  ;;  %p618_p9 = scmp.lt.u32.totalorder %s614_s2, %s810_s6 }
 0x366   :  { %p620_p10 = pnand %p618_p9, %p615_p8 }
 0x368   :  { %623 = shalt.err (!%p620_p10)
}
 0x369   :  { %304 = dma.vmem_to_hbm [thread:$0]  %s302_s27, 128, %s810_s6, [#allocation7]  }
 0x36a   :  { %642 = dma.done.wait [#allocation7], 128  }
 0x36b   :  { %643 = vsyncadd [#allocation7], 4294967168 }
 0x36c   :  { %308 = vsyncpa [#allocation6], 1 }
 0x36d   :  { %309 = vsyncpa [#allocation9], 1 }
 0x36e   :  { %310 = vsyncpa [#allocation7], 1 }

</bundles_post_ra>
